<compile_context>
chip_gen: v7x
topology: tpu7x:2x2x1
jax: 0.10.0
libtpu: 0.0.40
codegen_flags: <defaults>
</compile_context>

<pallas_src>
import math
import functools

import jax
import jax.numpy as jnp
from jax import lax
from jax.experimental import pallas as pl
from jax.experimental.pallas import tpu as pltpu


def _attn_kernel(x_ref, wq_ref, wk_ref, wv_ref, bq_ref, bk_ref, bv_ref,
                 res_ref, scores_ref, k_scratch, v_scratch,
                 *, tq, inv_sqrt_d, use_bf16_mxu):
    """Grid = (batch, q-tile).

    x_ref:      (1, S, D)  full-sequence X for this batch (resident across
                           q-tiles: its index_map is constant along qi)
    wq/wk/wv:   (D, D)     per-projection weights (pre-transposed: x @ W)
    bq/bk/bv:   (1, D)     per-projection biases
    res_ref:    (1, TQ, D) attention-result tile
    scores_ref: (1, TQ, S) raw attention-score tile
    k_scratch:  (S, D) f32 VMEM cache of K for this batch
    v_scratch:  (S, D) f32 VMEM cache of V for this batch
    """
    qi = pl.program_id(1)

    # K / V computed ONCE per batch (first q-tile) and cached in VMEM; the
    # q-tile grid axis is "arbitrary" so the scratch carries across steps.
    @pl.when(qi == 0)
    def _():
        xs = x_ref[0]                                            # (S, D)
        k_scratch[...] = (
            jnp.dot(xs, wk_ref[...], preferred_element_type=jnp.float32)
            + bk_ref[...])
        v_scratch[...] = (
            jnp.dot(xs, wv_ref[...], preferred_element_type=jnp.float32)
            + bv_ref[...])

    # q rows are already resident in the full-sequence x block; slice them
    # instead of DMA-ing a duplicate (TQ, D) input.
    q_start = pl.multiple_of(qi * tq, tq)
    xq = x_ref[0, pl.ds(q_start, tq), :]                         # (TQ, D)

    # 1/sqrt(D) folded into q (TQ*D elements) instead of scores (TQ*S).
    q = (jnp.dot(xq, wq_ref[...], preferred_element_type=jnp.float32)
         + bq_ref[...]) * inv_sqrt_d                             # (TQ, D)

    k = k_scratch[...]
    v = v_scratch[...]
    if use_bf16_mxu:                                             # static flag
        q = q.astype(jnp.bfloat16)
        k = k.astype(jnp.bfloat16)
        v = v.astype(jnp.bfloat16)

    # q @ K^T with the transpose folded into the MXU operand feed (no vxpose).
    scores = lax.dot_general(
        q, k,
        dimension_numbers=(((1,), (1,)), ((), ())),
        preferred_element_type=jnp.float32)                      # (TQ, S)

    # NOTE: the reference computes softmax(scores) but never uses it, so the
    # softmax is omitted (dead value; no effect on either returned output).
    s_op = scores.astype(jnp.bfloat16) if use_bf16_mxu else scores
    res = jnp.dot(s_op, v, preferred_element_type=jnp.float32)   # (TQ, D)

    res_ref[0] = res.astype(res_ref.dtype)
    scores_ref[0] = scores.astype(scores_ref.dtype)


def _pick_q_tile(s, want):
    """Largest divisor of `s` that is <= `want` and layout-friendly.

    Prefers lane-aligned (multiple of 128) tiles, then sublane-aligned
    (multiple of 8); falls back to the full sequence length.
    """
    want = max(1, min(want, s))
    best = None
    for t in range(want, 0, -1):
        if s % t:
            continue
        if t % 128 == 0:
            return t
        if best is None and (t % 8 == 0 or t == s):
            best = t
    # TODO(synk): pad/mask the last q-tile instead of falling back to a single
    # full-S tile when S has no aligned divisor (rare, e.g. prime-ish S).
    return best if best is not None else s


def _vmem_limit_bytes(S, D, tq):
    f32 = 4
    est = (
        2 * S * D * f32                  # x block (double-buffered)
        + 3 * D * D * f32                # Wq/Wk/Wv (single-buffered)
        + 3 * 8 * max(D, 128) * f32      # biases (padded; negligible)
        + 2 * S * D * f32                # K / V VMEM scratch
        + 2 * tq * D * f32               # res output block (double-buffered)
        + 2 * tq * S * f32               # scores output block (double-buffered)
        + 2 * tq * S * f32               # in-kernel f32 temporaries (q, scores)
    )
    est = int(est * 1.25)                # ~20-25% headroom
    return max(32 * 1024 * 1024, min(est, 128 * 1024 * 1024))


def scale_dot_product_attention(x, w_qkv, b_qkv, *, tq=128, use_bf16_mxu=False):
    """x: (B, S, D) f32; w_qkv: (3D, D) [PyTorch Linear layout]; b_qkv: (3D,).

    Returns (attention_res, attention_scores) exactly like the PyTorch module
    (raw, un-softmaxed scores feed scores @ V).

    tq=128 feeds the MXU fully on v5e and keeps the per-step footprint modest;
    on v6e (128 MiB VMEM, 256x256 MXU) sweeping tq=256 is worthwhile.
    use_bf16_mxu=False by default to preserve reference-level (1e-4) accuracy.
    """
    B, S, D = x.shape
    w = jnp.asarray(w_qkv)                               # (3D, D)
    b = jnp.asarray(b_qkv)                               # (3D,)

    # Per-projection weights, transposed so the kernel does x @ W.
    w_q = w[0 * D:1 * D, :].T
    w_k = w[1 * D:2 * D, :].T
    w_v = w[2 * D:3 * D, :].T
    b_q = b[0 * D:1 * D].reshape(1, D)
    b_k = b[1 * D:2 * D].reshape(1, D)
    b_v = b[2 * D:3 * D].reshape(1, D)

    tq = _pick_q_tile(S, tq)
    n_q_tiles = S // tq

    kernel = functools.partial(
        _attn_kernel, tq=tq, inv_sqrt_d=1.0 / math.sqrt(D),
        use_bf16_mxu=use_bf16_mxu)

    out_shapes = (
        jax.ShapeDtypeStruct((B, S, D), x.dtype),        # attention_res
        jax.ShapeDtypeStruct((B, S, S), x.dtype),        # attention_scores
    )

    # Weights / biases: constant index_map (stay resident) + single-buffered
    # (no point double-buffering blocks that never change).
    w_spec = pl.BlockSpec((D, D), lambda bi, qi: (0, 0),
                          pipeline_mode=pl.Buffered(1))
    b_spec = pl.BlockSpec((1, D), lambda bi, qi: (0, 0),
                          pipeline_mode=pl.Buffered(1))

    grid_spec = pltpu.PrefetchScalarGridSpec(
        num_scalar_prefetch=0,
        grid=(B, n_q_tiles),
        in_specs=[
            # Full-sequence X of the current batch; constant along qi so it is
            # DMA'd once per batch. Q rows are sliced from it in-kernel.
            pl.BlockSpec((1, S, D), lambda bi, qi: (bi, 0, 0)),
            w_spec, w_spec, w_spec,
            b_spec, b_spec, b_spec,
        ],
        out_specs=[
            pl.BlockSpec((1, tq, D), lambda bi, qi: (bi, qi, 0)),
            pl.BlockSpec((1, tq, S), lambda bi, qi: (bi, qi, 0)),
        ],
        scratch_shapes=[
            pltpu.VMEM((S, D), jnp.float32),             # K cache
            pltpu.VMEM((S, D), jnp.float32),             # V cache
        ],
    )

    return pl.pallas_call(
        kernel,
        out_shape=out_shapes,
        grid_spec=grid_spec,
        compiler_params=pltpu.CompilerParams(
            # Batch axis "parallel" (megacore sharding on v7x); q-tile axis is
            # "arbitrary" because the K/V scratch carries across it.
            dimension_semantics=("parallel", "arbitrary"),
            vmem_limit_bytes=_vmem_limit_bytes(S, D, tq),
        ),
    )(x, w_q, w_k, w_v, b_q, b_k, b_v)


def _reference(x, w_qkv, b_qkv):
    """Pure-JAX reference mirroring the PyTorch forward."""
    D = x.shape[-1]
    qkv = jnp.einsum("bsd,ed->bse", x, w_qkv) + b_qkv    # Linear: x @ W^T + b
    q, k, v = qkv[..., :D], qkv[..., D:2 * D], qkv[..., 2 * D:]
    scores = jnp.einsum("bqd,bkd->bqk", q, k) / math.sqrt(D)
    res = jnp.einsum("bqk,bkd->bqd", scores, v)
    return res, scores


if __name__ == "__main__":
    B, S, D = 2, 8, 32

    key = jax.random.PRNGKey(0)
    kx, kw, kb = jax.random.split(key, 3)

    x = jax.random.normal(kx, (B, S, D), dtype=jnp.float32)

    # Deterministic init matching nn.Linear(D, 3D): weight (3D, D), bias (3D,)
    bound = 1.0 / math.sqrt(D)
    w_qkv = jax.random.uniform(kw, (3 * D, D), minval=-bound, maxval=bound,
                               dtype=jnp.float32)
    b_qkv = jax.random.uniform(kb, (3 * D,), minval=-bound, maxval=bound,
                               dtype=jnp.float32)

    res, scores = scale_dot_product_attention(x, w_qkv, b_qkv)
    jax.block_until_ready((res, scores))

    res_ref, scores_ref = _reference(x, w_qkv, b_qkv)
    assert jnp.allclose(res, res_ref, atol=1e-4, rtol=1e-4)
    assert jnp.allclose(scores, scores_ref, atol=1e-4, rtol=1e-4)

    print("KERNEL_OK")
</pallas_src>

<mosaic_0001>
module attributes {stable_mosaic.version = 11 : i64} {
  func.func @_attn_kernel(%arg0: i32, %arg1: i32, %arg2: memref<1x8x32xf32, #tpu.memory_space<vmem>>, %arg3: memref<32x32xf32, #tpu.memory_space<vmem>>, %arg4: memref<32x32xf32, #tpu.memory_space<vmem>>, %arg5: memref<32x32xf32, #tpu.memory_space<vmem>>, %arg6: memref<1x32xf32, #tpu.memory_space<vmem>>, %arg7: memref<1x32xf32, #tpu.memory_space<vmem>>, %arg8: memref<1x32xf32, #tpu.memory_space<vmem>>, %arg9: memref<1x8x32xf32, #tpu.memory_space<vmem>>, %arg10: memref<1x8x8xf32, #tpu.memory_space<vmem>>, %arg11: memref<8x32xf32, #tpu.memory_space<vmem>>, %arg12: memref<8x32xf32, #tpu.memory_space<vmem>>) attributes {dimension_semantics = [#tpu.dimension_semantics<parallel>, #tpu.dimension_semantics<arbitrary>], iteration_bounds = array<i64: 2, 1>, scalar_prefetch = 0 : i64, scratch_operands = 2 : i64, tpu.core_type = #tpu.core_type<tc>, window_params = [{transform_indices = @transform_0, window_bounds = array<i64: 1, 8, 32>}, {pipeline_mode = #tpu.pipeline_mode<synchronous>, transform_indices = @transform_1, window_bounds = array<i64: 32, 32>}, {pipeline_mode = #tpu.pipeline_mode<synchronous>, transform_indices = @transform_2, window_bounds = array<i64: 32, 32>}, {pipeline_mode = #tpu.pipeline_mode<synchronous>, transform_indices = @transform_3, window_bounds = array<i64: 32, 32>}, {pipeline_mode = #tpu.pipeline_mode<synchronous>, transform_indices = @transform_4, window_bounds = array<i64: 1, 32>}, {pipeline_mode = #tpu.pipeline_mode<synchronous>, transform_indices = @transform_5, window_bounds = array<i64: 1, 32>}, {pipeline_mode = #tpu.pipeline_mode<synchronous>, transform_indices = @transform_6, window_bounds = array<i64: 1, 32>}, {transform_indices = @transform_7, window_bounds = array<i64: 1, 8, 32>}, {transform_indices = @transform_8, window_bounds = array<i64: 1, 8, 8>}]} {
    %c0_i32 = arith.constant 0 : i32
    %0 = arith.cmpi eq, %arg1, %c0_i32 : i32
    %1 = arith.extui %0 : i1 to i32
    %c0_i32_0 = arith.constant 0 : i32
    %2 = arith.cmpi ne, %1, %c0_i32_0 : i32
    scf.if %2 {
      %c0_19 = arith.constant 0 : index
      %c0_20 = arith.constant 0 : index
      %c0_21 = arith.constant 0 : index
      %25 = vector.load %arg2[%c0_19, %c0_20, %c0_21] : memref<1x8x32xf32, #tpu.memory_space<vmem>>, vector<1x8x32xf32>
      %26 = vector.shape_cast %25 : vector<1x8x32xf32> to vector<8x32xf32>
      %c0_22 = arith.constant 0 : index
      %c0_23 = arith.constant 0 : index
      %27 = vector.load %arg4[%c0_22, %c0_23] : memref<32x32xf32, #tpu.memory_space<vmem>>, vector<32x32xf32>
      %cst_24 = arith.constant dense<0.000000e+00> : vector<8x32xf32>
      %28 = tpu.matmul %26, %27, %cst_24 {dimension_numbers = #tpu.dot_dimension_numbers<[1], [0], [0], [1], [0, 0, 1, 1], [], []>} : vector<8x32xf32>, vector<32x32xf32>, vector<8x32xf32> -> vector<8x32xf32>
      %c0_25 = arith.constant 0 : index
      %c0_26 = arith.constant 0 : index
      %29 = vector.load %arg7[%c0_25, %c0_26] : memref<1x32xf32, #tpu.memory_space<vmem>>, vector<1x32xf32>
      %30 = vector.broadcast %29 : vector<1x32xf32> to vector<8x32xf32>
      %31 = arith.addf %28, %30 : vector<8x32xf32>
      %c0_27 = arith.constant 0 : index
      %c0_28 = arith.constant 0 : index
      %32 = vector.load %arg11[%c0_27, %c0_28] : memref<8x32xf32, #tpu.memory_space<vmem>>, vector<8x32xf32>
      tpu.vector_store %arg11[%c0_27, %c0_28], %31 {strides = array<i32>} : memref<8x32xf32, #tpu.memory_space<vmem>>, vector<8x32xf32>,
      %c0_29 = arith.constant 0 : index
      %c0_30 = arith.constant 0 : index
      %33 = vector.load %arg5[%c0_29, %c0_30] : memref<32x32xf32, #tpu.memory_space<vmem>>, vector<32x32xf32>
      %cst_31 = arith.constant dense<0.000000e+00> : vector<8x32xf32>
      %34 = tpu.matmul %26, %33, %cst_31 {dimension_numbers = #tpu.dot_dimension_numbers<[1], [0], [0], [1], [0, 0, 1, 1], [], []>} : vector<8x32xf32>, vector<32x32xf32>, vector<8x32xf32> -> vector<8x32xf32>
      %c0_32 = arith.constant 0 : index
      %c0_33 = arith.constant 0 : index
      %35 = vector.load %arg8[%c0_32, %c0_33] : memref<1x32xf32, #tpu.memory_space<vmem>>, vector<1x32xf32>
      %36 = vector.broadcast %35 : vector<1x32xf32> to vector<8x32xf32>
      %37 = arith.addf %34, %36 : vector<8x32xf32>
      %c0_34 = arith.constant 0 : index
      %c0_35 = arith.constant 0 : index
      %38 = vector.load %arg12[%c0_34, %c0_35] : memref<8x32xf32, #tpu.memory_space<vmem>>, vector<8x32xf32>
      tpu.vector_store %arg12[%c0_34, %c0_35], %37 {strides = array<i32>} : memref<8x32xf32, #tpu.memory_space<vmem>>, vector<8x32xf32>,
    } else {
    }
    %c8_i32 = arith.constant 8 : i32
    %3 = arith.muli %arg1, %c8_i32 : i32
    %4 = tpu.assume_multiple %3, 8 : i32
    %c0 = arith.constant 0 : index
    %5 = arith.index_cast %4 : i32 to index
    %c0_1 = arith.constant 0 : index
    %6 = vector.load %arg2[%c0, %5, %c0_1] : memref<1x8x32xf32, #tpu.memory_space<vmem>>, vector<1x8x32xf32>
    %7 = vector.shape_cast %6 : vector<1x8x32xf32> to vector<8x32xf32>
    %c0_2 = arith.constant 0 : index
    %c0_3 = arith.constant 0 : index
    %8 = vector.load %arg3[%c0_2, %c0_3] : memref<32x32xf32, #tpu.memory_space<vmem>>, vector<32x32xf32>
    %cst = arith.constant dense<0.000000e+00> : vector<8x32xf32>
    %9 = tpu.matmul %7, %8, %cst {dimension_numbers = #tpu.dot_dimension_numbers<[1], [0], [0], [1], [0, 0, 1, 1], [], []>} : vector<8x32xf32>, vector<32x32xf32>, vector<8x32xf32> -> vector<8x32xf32>
    %c0_4 = arith.constant 0 : index
    %c0_5 = arith.constant 0 : index
    %10 = vector.load %arg6[%c0_4, %c0_5] : memref<1x32xf32, #tpu.memory_space<vmem>>, vector<1x32xf32>
    %11 = vector.broadcast %10 : vector<1x32xf32> to vector<8x32xf32>
    %12 = arith.addf %9, %11 : vector<8x32xf32>
    %cst_6 = arith.constant 0.176776692 : f32
    %13 = vector.broadcast %cst_6 : f32 to vector<8x32xf32>
    %14 = arith.mulf %12, %13 : vector<8x32xf32>
    %c0_7 = arith.constant 0 : index
    %c0_8 = arith.constant 0 : index
    %15 = vector.load %arg11[%c0_7, %c0_8] : memref<8x32xf32, #tpu.memory_space<vmem>>, vector<8x32xf32>
    %c0_9 = arith.constant 0 : index
    %c0_10 = arith.constant 0 : index
    %16 = vector.load %arg12[%c0_9, %c0_10] : memref<8x32xf32, #tpu.memory_space<vmem>>, vector<8x32xf32>
    %cst_11 = arith.constant dense<0.000000e+00> : vector<8x8xf32>
    %17 = tpu.matmul %14, %15, %cst_11 {dimension_numbers = #tpu.dot_dimension_numbers<[1], [1], [0], [0], [0, 0, 1, 0], [], []>} : vector<8x32xf32>, vector<8x32xf32>, vector<8x8xf32> -> vector<8x8xf32>
    %cst_12 = arith.constant dense<0.000000e+00> : vector<8x32xf32>
    %18 = tpu.matmul %17, %16, %cst_12 {dimension_numbers = #tpu.dot_dimension_numbers<[1], [0], [0], [1], [0, 0, 1, 1], [], []>} : vector<8x8xf32>, vector<8x32xf32>, vector<8x32xf32> -> vector<8x32xf32>
    %c0_13 = arith.constant 0 : index
    %c0_14 = arith.constant 0 : index
    %c0_15 = arith.constant 0 : index
    %19 = vector.load %arg9[%c0_13, %c0_14, %c0_15] : memref<1x8x32xf32, #tpu.memory_space<vmem>>, vector<1x8x32xf32>
    %20 = vector.shape_cast %19 : vector<1x8x32xf32> to vector<8x32xf32>
    %21 = vector.shape_cast %18 : vector<8x32xf32> to vector<1x8x32xf32>
    tpu.vector_store %arg9[%c0_13, %c0_14, %c0_15], %21 {strides = array<i32>} : memref<1x8x32xf32, #tpu.memory_space<vmem>>, vector<1x8x32xf32>,
    %c0_16 = arith.constant 0 : index
    %c0_17 = arith.constant 0 : index
    %c0_18 = arith.constant 0 : index
    %22 = vector.load %arg10[%c0_16, %c0_17, %c0_18] : memref<1x8x8xf32, #tpu.memory_space<vmem>>, vector<1x8x8xf32>
    %23 = vector.shape_cast %22 : vector<1x8x8xf32> to vector<8x8xf32>
    %24 = vector.shape_cast %17 : vector<8x8xf32> to vector<1x8x8xf32>
    tpu.vector_store %arg10[%c0_16, %c0_17, %c0_18], %24 {strides = array<i32>} : memref<1x8x8xf32, #tpu.memory_space<vmem>>, vector<1x8x8xf32>,
    return
  }
  func.func @transform_0(%arg0: i32, %arg1: i32) -> (i32, i32, i32) {
    %c0_i32 = arith.constant 0 : i32
    %c0_i32_0 = arith.constant 0 : i32
    %c0_i32_1 = arith.constant 0 : i32
    return %arg0, %c0_i32, %c0_i32_0 : i32, i32, i32
  }
  func.func @transform_1(%arg0: i32, %arg1: i32) -> (i32, i32) {
    %c0_i32 = arith.constant 0 : i32
    %c0_i32_0 = arith.constant 0 : i32
    %c0_i32_1 = arith.constant 0 : i32
    return %c0_i32, %c0_i32_0 : i32, i32
  }
  func.func @transform_2(%arg0: i32, %arg1: i32) -> (i32, i32) {
    %c0_i32 = arith.constant 0 : i32
    %c0_i32_0 = arith.constant 0 : i32
    %c0_i32_1 = arith.constant 0 : i32
    return %c0_i32, %c0_i32_0 : i32, i32
  }
  func.func @transform_3(%arg0: i32, %arg1: i32) -> (i32, i32) {
    %c0_i32 = arith.constant 0 : i32
    %c0_i32_0 = arith.constant 0 : i32
    %c0_i32_1 = arith.constant 0 : i32
    return %c0_i32, %c0_i32_0 : i32, i32
  }
  func.func @transform_4(%arg0: i32, %arg1: i32) -> (i32, i32) {
    %c0_i32 = arith.constant 0 : i32
    %c0_i32_0 = arith.constant 0 : i32
    %c0_i32_1 = arith.constant 0 : i32
    return %c0_i32, %c0_i32_0 : i32, i32
  }
  func.func @transform_5(%arg0: i32, %arg1: i32) -> (i32, i32) {
    %c0_i32 = arith.constant 0 : i32
    %c0_i32_0 = arith.constant 0 : i32
    %c0_i32_1 = arith.constant 0 : i32
    return %c0_i32, %c0_i32_0 : i32, i32
  }
  func.func @transform_6(%arg0: i32, %arg1: i32) -> (i32, i32) {
    %c0_i32 = arith.constant 0 : i32
    %c0_i32_0 = arith.constant 0 : i32
    %c0_i32_1 = arith.constant 0 : i32
    return %c0_i32, %c0_i32_0 : i32, i32
  }
  func.func @transform_7(%arg0: i32, %arg1: i32) -> (i32, i32, i32) {
    %c0_i32 = arith.constant 0 : i32
    %c0_i32_0 = arith.constant 0 : i32
    return %arg0, %arg1, %c0_i32 : i32, i32, i32
  }
  func.func @transform_8(%arg0: i32, %arg1: i32) -> (i32, i32, i32) {
    %c0_i32 = arith.constant 0 : i32
    %c0_i32_0 = arith.constant 0 : i32
    return %arg0, %arg1, %c0_i32 : i32, i32, i32
  }
}

</mosaic_0001>

<bundles_post_ra>
// kernel: tpu_custom_call.1
= control target key start
LH: loop header
LB: loop body
LE: loop exit
PB: predicated region body
PF: predicated region fallthrough
CT: control target
= control target key end

     0   :  { %s1833_s0 = inlined_call_operand.hbm [shape: f32[2,8,32], index: 0, kind: input, shape index: {}]   ;;  %s1834_s1 = inlined_call_operand.hbm [shape: f32[32,32], index: 1, kind: input, shape index: {}]   ;;  %s1835_s2 = inlined_call_operand.hbm [shape: f32[32,32], index: 2, kind: input, shape index: {}]   ;;  %s1836_s3 = inlined_call_operand.hbm [shape: f32[32,32], index: 3, kind: input, shape index: {}]   ;;  %s1837_s4 = inlined_call_operand.vmem [shape: f32[1,32], index: 4, kind: input, shape index: {}]   ;;  %s1838_s5 = inlined_call_operand.vmem [shape: f32[1,32], index: 5, kind: input, shape index: {}]   ;;  %s1839_s6 = inlined_call_operand.vmem [shape: f32[1,32], index: 6, kind: input, shape index: {}]   ;;  %s1840_s7 = inlined_call_operand.hbm [shape: f32[2,8,32], index: 7, kind: output, shape index: {0}]   ;;  %s1841_s8 = inlined_call_operand.hbm [shape: f32[2,8,8], index: 8, kind: output, shape index: {1}]  }
   0x1   :  { %1851 = sst [smem:[#allocation23_spill]] %s1840_s7 }
   0x2   :  { %1852 = sst [smem:[#allocation24_spill]] %s1841_s8 }
   0x3   :  { %14 = vsyncpa [#allocation5], 0 }
   0x4   :  { %16 = vsyncpa [#allocation5 + $0x1], 0 }
   0x5   :  { %17 = vsyncpa [#allocation8], 0 }
   0x6   :  { %18 = vsyncpa [#allocation11], 0 }
   0x7   :  { %19 = vsyncpa [#allocation6], 0 }
   0x8   :  { %21 = vsyncpa [#allocation6 + $0x1], 0 }
   0x9   :  { %22 = vsyncpa [#allocation14], 0 }
   0xa   :  { %24 = vsyncpa [#allocation14 + $0x1], 0  ;;  %s1493_s27 = smov 0   ;;  %s1495_s28 = smov 0  }
   0xb   :  { %s1497_s29 = smov 0   ;;  %s1499_s30 = smov 0  }
   0xc   :  { %s1501_s9 = smov 0   ;;  %s1503_s10 = smov 0  }
   0xd LB: > { %1853 = sst [smem:[#allocation20_spill]] %s1415_s27  ;;  %s985_s11 = sadd.s32 4294967295, %s1435_s10   ;;  %s1435_s10 = sphi %s1503_s10, %s30_s10   ;;  %s1431_s9 = sphi %s1501_s9, %s1880_s9   ;;  %s1427_s30 = sphi %s1499_s30, %s1879_s30   ;;  %s1423_s29 = sphi %s1497_s29, %s1878_s29   ;;  %s1419_s28 = sphi %s1495_s28, %s1877_s28   ;;  %s1415_s27 = sphi %s1493_s27, %s1876_s27  }
   0xe   : > { %1854 = sst [smem:[#allocation21_spill]] %s1427_s30  ;;  %s986_s12 = sadd.s32 4294967294, %s1435_s10  }
   0xf   : > { %p62_p0 = scmp.ne.s32.totalorder %s1419_s28, %s1415_s27  ;;  %p1527_p1 = scmp.eq.s32.totalorder %s985_s11, 0 }
  0x10   : > { %p1531_p2 = scmp.eq.s32.totalorder %s985_s11, 1  ;;  %p220_p3 = scmp.eq.s32.totalorder %s986_s12, 1 }
  0x11   : > { %s1855_s13 = scalar_select %p1527_p1, 1, 0 }
  0x12   : > { %s1856_s14 = scalar_select %p1531_p2, 1, 0 }
  0x13   : > { %p1537_p4 = por %p1527_p1, %p62_p0  ;;  %p987_p5 = scmp.ge.s32.totalorder %s1435_s10, 1 }
  0x14   : > { %p1542_p6 = por %p220_p3, %p62_p0  ;;  %p255_p7 = scmp.lt.s32.totalorder %s1435_s10, 3 }
  0x15   : > { %s1857_s15 = scalar_select %p1537_p4, 1, 0 }
  0x16   : > { %s1858_s16 = scalar_select %p1542_p6, 1, 0 }
  0x17   : > { %p1547_p8 = pnand %p987_p5, %p255_p7  ;;  %s1437_s18 = smov [#allocation7]  }
  0x18   : > { %1859 = sst [smem:[#allocation22_spill]] %s1858_s16  ;;  %s267_s19 = sshll.u32 %s1437_s18, 4  ;;  %s1551_s19 = int_to_ptr.vmem [resolvable:$true] %s267_s19 }
  0x19   : > { %s1860_s17 = scalar_select %p1547_p8, 1, 0 }
  0x1a   : > { %p1114_p9 = pneg %p1547_p8  ;;  %s1438_s21 = smov [#allocation9]  }
  0x1b   : > { %s280_s22 = sshll.u32 %s1438_s21, 4  ;;  %s1439_s23 = smov [#allocation10]   ;;  %s1562_s22 = int_to_ptr.vmem [resolvable:$true] %s280_s22 }
  0x1c   : > { %p1558_p11 = pnand %p1114_p9, %p1527_p1  ;;  %s1564_s24 = sshll.u32 %s1439_s23, 4  ;;  %s294_s24 = int_to_ptr.vmem [resolvable:$true] %s1564_s24 }
  0x1d   : > { %s1199_s11 = scalar_lea.hbm %s1834_s1, 512 }
  0x1e   : > { %p1200_p12 = scmp.ne.s32.totalorder %s1834_s1, %s1199_s11  ;;  %p1574_p13 = pneg %p1558_p11 }
  0x1f   : > { %p1206_p5 = scmp.lt.u32.totalorder %s1199_s11, %s1834_s1 }
  0x20   : > { %p1202_p0 = pnand %p1574_p13, %p1200_p12 }
  0x22   : > { %p1203_p3 = pneg %p1202_p0 }
  0x24   : > { %p1208_p7 = pnand %p1206_p5, %p1203_p3 }
  0x26   : > { %1211 = shalt.err (!%p1208_p7)
}
  0x27   : > { %s1212_s25 = scalar_lea.vmem %s1551_s19, 512  ;;  %p1220_p1 = scmp.lt.s32.totalorder %s1551_s19, %s1551_s19 }
  0x28   : > { %p1213_p9 = scmp.ne.s32.totalorder %s1551_s19, %s1212_s25  ;;  %p1221_p4 = scmp.lt.s32.totalorder %s1212_s25, %s1212_s25 }
  0x2a   : > { %p1215_p10 = pnand %p1213_p9, %p1574_p13  ;;  %p1222_p12 = por %p1221_p4, %p1220_p1 }
  0x2c   : > { %p1216_p6 = pneg %p1215_p10 }
  0x2e   : > { %p1223_p0 = pnand %p1222_p12, %p1216_p6 }
  0x30   : > { %1226 = shalt.err (!%p1223_p0)
}
  0x31   : > { %s1440_s26 = smov 128   ;;  %s1441_s11 = smov 8  }
  0x32   : > { %1117 = dma.hbm_to_vmem [thread:$0]  (!%p1558_p11), %s1834_s1, 512, %s1551_s19, [#allocation8], %s1440_s26, %s1440_s26, %s1441_s11  }
  0x33   : > { %s1227_s25 = scalar_lea.hbm %s1835_s2, 512 }
  0x34   : > { %p1228_p1 = scmp.ne.s32.totalorder %s1835_s2, %s1227_s25  ;;  %p1234_p10 = scmp.lt.u32.totalorder %s1227_s25, %s1835_s2 }
  0x36   : > { %p1230_p4 = pnand %p1228_p1, %p1574_p13 }
  0x38   : > { %p1231_p6 = pneg %p1230_p4 }
  0x3a   : > { %p1236_p3 = pnand %p1234_p10, %p1231_p6 }
  0x3c   : > { %1239 = shalt.err (!%p1236_p3)
}
  0x3d   : > { %s1240_s19 = scalar_lea.vmem %s1562_s22, 512  ;;  %p1248_p12 = scmp.lt.s32.totalorder %s1562_s22, %s1562_s22 }
  0x3e   : > { %p1241_p5 = scmp.ne.s32.totalorder %s1562_s22, %s1240_s19  ;;  %p1249_p0 = scmp.lt.s32.totalorder %s1240_s19, %s1240_s19 }
  0x40   : > { %p1243_p7 = pnand %p1241_p5, %p1574_p13  ;;  %p1250_p1 = por %p1249_p0, %p1248_p12 }
  0x42   : > { %p1244_p9 = pneg %p1243_p7 }
  0x44   : > { %p1251_p4 = pnand %p1250_p1, %p1244_p9 }
  0x46   : > { %1254 = shalt.err (!%p1251_p4)
}
  0x47   : > { %1120 = dma.hbm_to_vmem [thread:$0]  (!%p1558_p11), %s1835_s2, 512, %s1562_s22, [#allocation8], %s1440_s26, %s1440_s26, %s1441_s11  }
  0x48   : > { %s1255_s12 = scalar_lea.hbm %s1836_s3, 512 }
  0x49   : > { %p1256_p6 = scmp.ne.s32.totalorder %s1836_s3, %s1255_s12  ;;  %p1262_p5 = scmp.lt.u32.totalorder %s1255_s12, %s1836_s3 }
  0x4b   : > { %p1258_p10 = pnand %p1256_p6, %p1574_p13 }
  0x4d   : > { %p1259_p3 = pneg %p1258_p10 }
  0x4f   : > { %p1264_p7 = pnand %p1262_p5, %p1259_p3 }
  0x51   : > { %1267 = shalt.err (!%p1264_p7)
}
  0x52   : > { %s1268_s19 = scalar_lea.vmem %s294_s24, 512  ;;  %p1276_p1 = scmp.lt.s32.totalorder %s294_s24, %s294_s24 }
  0x53   : > { %p1269_p9 = scmp.ne.s32.totalorder %s294_s24, %s1268_s19  ;;  %p1277_p4 = scmp.lt.s32.totalorder %s1268_s19, %s1268_s19 }
  0x55   : > { %p1271_p12 = pnand %p1269_p9, %p1574_p13  ;;  %p1278_p8 = por %p1277_p4, %p1276_p1 }
  0x57   : > { %p1272_p0 = pneg %p1271_p12 }
  0x59   : > { %p1279_p2 = pnand %p1278_p8, %p1272_p0 }
  0x5b   : > { %1282 = shalt.err (!%p1279_p2)
}
  0x5c   : > { %1123 = dma.hbm_to_vmem [thread:$0]  (!%p1558_p11), %s1836_s3, 512, %s294_s24, [#allocation11], %s1440_s26, %s1440_s26, %s1441_s11  }
  0x5d   : > { %s49_s16 = sadd.s32 1, %s1423_s29  ;;  %s42_s20 = sadd.s32 1, %s1431_s9 }
  0x5e   : > { %p56_p2 = scmp.ne.s32.totalorder %s1423_s29, %s1419_s28  ;;  %p44_p8 = scmp.ge.s32.totalorder %s42_s20, 2 }
  0x5f   : > { %p57_p13 = scmp.eq.s32.totalorder %s1435_s10, 0  ;;  %p1863_p6 = scmp.ne.s32.totalorder %s1856_s14, 0 }
  0x60   : > { %p1138_p3 = scmp.lt.s32.totalorder %s1435_s10, 2  ;;  %s1882_s20 = smov (%p44_p8, %s42_s20), 0 }
  0x61   : > { %p1653_p10 = por %p1863_p6, %p56_p2  ;;  %p58_p5 = por %p57_p13, %p56_p2 }
  0x62   : > { %s316_s27 = sand.u32 1, %s1423_s29   ;;  %s46_s30 = ssub.s32 %s1431_s9, %s1882_s20 }
  0x63   : > { %p47_p7 = scmp.eq.s32.totalorder %s46_s30, 0  ;;  %s992_s24 = sshll.u32 %s316_s27, 3 }
  0x64   : > { %s993_s26 = sshll.u32 %s1431_s9, 7  ;;  %s320_s21 = scalar_lea.vmem [#allocation4], %s992_s24 }
  0x65   : > { %s1665_s11 = scalar_select %p47_p7, %s1423_s29, %s49_s16  }
  0x66   : > { %s1670_s14 = scalar_lea.hbm %s1833_s0, %s993_s26  ;;  %s327_s23 = sshll.u32 %s320_s21, 4  ;;  %s1672_s23 = int_to_ptr.vmem [resolvable:$true] %s327_s23 }
  0x67   : > { %p1676_p11 = pnand %p1138_p3, %p58_p5  ;;  %s317_s19 = scalar_lea.sflag [#allocation5], %s316_s27 }
  0x68   : > { %s1283_s22 = scalar_lea.hbm %s1670_s14, 128  ;;  %s1288_s30 = scalar_lea.hbm %s1833_s0, 256 }
  0x69   : > { %p1284_p9 = scmp.ne.s32.totalorder %s1670_s14, %s1283_s22  ;;  %p1285_p12 = pneg %p1676_p11 }
  0x6a   : > { %p1289_p4 = scmp.lt.u32.totalorder %s1670_s14, %s1833_s0  ;;  %p1290_p2 = scmp.lt.u32.totalorder %s1288_s30, %s1283_s22 }
  0x6b   : > { %p1286_p0 = pnand %p1285_p12, %p1284_p9  ;;  %p1292_p13 = scmp.lt.u32.totalorder %s1283_s22, %s1670_s14 }
  0x6c   : > { %p1291_p8 = por %p1290_p2, %p1289_p4 }
  0x6d   : > { %p1287_p1 = pneg %p1286_p0 }
  0x6e   : > { %p1293_p6 = por %p1292_p13, %p1291_p8 }
  0x70   : > { %p1294_p3 = pnand %p1293_p6, %p1287_p1 }
  0x72   : > { %1297 = shalt.err (!%p1294_p3)
}
  0x73   : > { %s1298_s27 = scalar_lea.vmem %s1672_s23, 128  ;;  %s1442_s12 = smov [#allocation4]  }
  0x74   : > { %p1299_p5 = scmp.ne.s32.totalorder %s1672_s23, %s1298_s27  ;;  %s1303_s18 = sshll.u32 %s1442_s12, 4  ;;  %s1304_s18 = int_to_ptr.vmem [resolvable:$false] %s1303_s18 }
  0x75   : > { %s1305_s21 = scalar_lea.vmem %s1304_s18, 256  ;;  %p1306_p0 = scmp.lt.s32.totalorder %s1672_s23, %s1304_s18 }
  0x76   : > { %p1301_p7 = pnand %p1299_p5, %p1285_p12  ;;  %p1307_p4 = scmp.lt.s32.totalorder %s1305_s21, %s1298_s27 }
  0x78   : > { %p1302_p9 = pneg %p1301_p7  ;;  %p1308_p2 = por %p1307_p4, %p1306_p0 }
  0x7a   : > { %p1309_p8 = pnand %p1308_p2, %p1302_p9 }
  0x7c   : > { %1312 = shalt.err (!%p1309_p8)
}
  0x7d   : > { %1127 = dma.hbm_to_vmem [thread:$0]  (!%p1676_p11), %s1670_s14, 128, %s1672_s23, %s317_s19  }
  0x7e   : > { %p1866_p1 = scmp.ne.s32.totalorder %s1860_s17, 0 }
  0x7f   : > { %s1708_s22 = sand.u32 (!%p1866_p1), 1, %s1419_s28   ;;  %p1867_p12 = scmp.ne.s32.totalorder (!%p1866_p1), %s1857_s15, 0 }
  0x80   : > { %336 = sbr.rel (%p1866_p1) target bundleno = 815 (0x32f), region = 48  ;;  %s1711_s7 = sshll.u32 (!%p1866_p1), %s1708_s22, 3 }
  0x81   : > { %s339_s16 = scalar_lea.sflag (!%p1866_p1), [#allocation5], %s1708_s22  ;;  %s342_s30 = scalar_lea.vmem (!%p1866_p1), [#allocation4], %s1711_s7 }
  0x87   : > { %1394 = dma.done.wait (%p1867_p12), %s339_s16, 128  }
  0x88   : > { %1396 = vsyncadd (%p1867_p12), %s339_s16, 4294967168  ;;  %p1868_p11 = scmp.ne.s32.totalorder %s1855_s13, 0 }
  0x8a   : > { %1398 = dma.done.wait (%p1868_p11), [#allocation8], 1024  }
  0x8b   : > { %1400 = vsyncadd (%p1868_p11), [#allocation8], 4294966272 }
  0x8c   : > { %1402 = dma.done.wait (%p1868_p11), [#allocation11], 512  }
  0x8d   : > { %1404 = vsyncadd (%p1868_p11), [#allocation11], 4294966784  ;;  %v1443_v0 = vmov 0.0|0.0   ;;  %vm1444_vm0 = vmmov 0   ;;  %v1445_v1 = vmov 0.0   ;;  %v397_v2 = vld [vmem:[#allocation9] sm:$0xff] }
  0x8e   : > { %1078 = vmatprep.subr.bf16.mxu0 %v1443_v0  ;;  %1043 = vmatprep.mubr.msk.f32.mxu0 %vm1444_vm0, %v1445_v1  ;;  %v398_v3 = vld [vmem:[#allocation9 + $0x8] sm:$0xff]  ;;  %v399_v4 = vld [vmem:[#allocation9 + $0x10] sm:$0xff]  ;;  %v400_v6 = vld [vmem:[#allocation9 + $0x18] sm:$0xff]  ;;  %vm408_vm1 = vcmask 261120   ;;  %s1869_s19 = sld [smem:[#allocation21_spill]]  ;;  %vm732_vm2 = vcmask 64512  }
  0x8f   : > { %1084 = vmatprep.subr.bf16.mxu1 %v1443_v0  ;;  %1054 = vmatprep.mubr.msk.f32.mxu1 %vm1444_vm0, %v1445_v1  ;;  %v1079_v5 = vpack.c.bf16 %v398_v3, %v397_v2  ;;  %v1082_v7 = vpack.c.bf16 %v400_v6, %v399_v4  ;;  %v483_v8 = vld [vmem:[#allocation10] sm:$0xff]  ;;  %v484_v9 = vld [vmem:[#allocation10 + $0x8] sm:$0xff]  ;;  %v485_v10 = vld [vmem:[#allocation10 + $0x10] sm:$0xff]  ;;  %s391_s24 = scalar_lea.vmem [#allocation13], %s1711_s7  ;;  %s1870_s18 = sld [smem:[#allocation24_spill]] }
  0x90   : > { %v568_v11 = vld [vmem:[#allocation7] sm:$0xff]  ;;  %v569_v12 = vld [vmem:[#allocation7 + $0x8] sm:$0xff]  ;;  %v1085_v13 = vpack.c.bf16 %v484_v9, %v483_v8  ;;  %v486_v14 = vld [vmem:[#allocation10 + $0x18] sm:$0xff]  ;;  %s842_s16 = sshll.u32 %s391_s24, 4  ;;  %s1446_s15 = smov [#allocation13]   ;;  %s843_s16 = int_to_ptr.vmem [resolvable:$true] %s842_s16 }
  0x91   : > { %1080 = vmatpush3.bf16.msra.mxu0 %v1079_v5  ;;  %v1088_v15 = vpack.c.bf16 %v486_v14, %v485_v10  ;;  %v396_v16 = vld [vmem:[%s342_s30] sm:$0xff]  ;;  %v1091_v17 = vpack.c.bf16 %v569_v12, %v568_v11  ;;  %v1001_v21 = vld [vmem:[%s1838_s5] ss:$0 sm:$0xff]  ;;  %s814_s30 = scalar_lea.sflag [#allocation14], %s1708_s22  ;;  %s1313_s13 = scalar_lea.vmem %s843_s16, 128 }
  0x92   : > { %1081 = vmatprep.subr.bf16.mxu0 %v1443_v0  ;;  %1086 = vmatpush3.bf16.msra.mxu1 %v1085_v13  ;;  %v570_v18 = vld [vmem:[#allocation7 + $0x10] sm:$0xff]  ;;  %v571_v19 = vld [vmem:[#allocation7 + $0x18] sm:$0xff]  ;;  %v1003_v25 = vld [vmem:[%s1839_s6] ss:$0 sm:$0xff]  ;;  %p1314_p13 = scmp.ne.s32.totalorder %s843_s16, %s1313_s13  ;;  %s1317_s17 = sshll.u32 %s1446_s15, 4  ;;  %s1318_s17 = int_to_ptr.vmem [resolvable:$false] %s1317_s17 }
  0x93   : > { %1087 = vmatprep.subr.bf16.mxu1 %v1443_v0  ;;  %v1094_v20 = vpack.c.bf16 %v571_v19, %v570_v18  ;;  %v1005_v29 = vld [vmem:[%s1837_s4] ss:$0 sm:$0xff]  ;;  %s1319_s14 = scalar_lea.vmem %s1318_s17, 256  ;;  %p1320_p5 = scmp.lt.s32.totalorder %s843_s16, %s1318_s17 }
  0x94   : > { %s1012_s26 = sshll.u32 %s1869_s19, 7  ;;  %p1315_p6 = pnand %p1314_p13, %p1653_p10 }
  0x95   : > { %1083 = vmatpush3.bf16.msra.mxu0 %v1082_v7  ;;  %s1757_s21 = scalar_lea.hbm %s1870_s18, %s1012_s26  ;;  %p1321_p7 = scmp.lt.s32.totalorder %s1319_s14, %s1313_s13 }
  0x96   : > { %1090 = vmatprep.subr.bf16.mxu0 %v1443_v0  ;;  %1089 = vmatpush3.bf16.msra.mxu1 %v1088_v15  ;;  %p1316_p3 = pneg %p1315_p6 }
  0x97   : > { %1068 = vmatprep.subr.mxu1 %v1445_v1  ;;  %p1322_p9 = por %p1321_p7, %p1320_p5 }
  0x98   : > { %1044 = vmatmul.mubr.msk.f32.vlgmr.msra.gmra.mrb[0].mxu0 %vm408_vm1, %v396_v16 }
  0x99   : > { %1092 = vmatpush3.bf16.msra.mxu0 %v1091_v17  ;;  %1065 = vmatprep.mubr.msk.f32.mxu0 %vm1444_vm0, %v1445_v1  ;;  %p1323_p0 = pnand %p1322_p9, %p1316_p3 }
  0x9a   : > { %1093 = vmatprep.subr.bf16.mxu0 %v1443_v0  ;;  %1055 = vmatmul.mubr.msk.f32.vlgmr.msra.gmra.mrb[0].mxu1 %vm408_vm1, %v396_v16 }
  0x9b   : > { %1070 = vmatprep.mubr.msk.f32.mxu1 %vm1444_vm0, %v1445_v1 }
  0x9d   : > { %1095 = vmatpush3.bf16.msra.mxu0 %v1094_v20 }
  0xa0   : > { %1066 = vmatmul.mubr.msk.f32.vlgmr.msra.gmra.mrb[2].mxu0 %vm408_vm1, %v396_v16 }
 0x16b   : > { %v478_v22 = vpop.f32.mrb[0].mxu0 }
 0x16c   : > { %v479_v23 = vadd.f32 %v1001_v21, %v478_v22  ;;  %v1045_v24 = vpop.f32.mrb[1].mxu0 }
 0x16d   : > { %v560_v26 = vpop.f32.mrb[0].mxu1 }
 0x16e   : > { %482 = vst.msk [vmem:[#allocation2] sm:$0xff] %vm408_vm1, %v479_v23  ;;  %v561_v27 = vadd.f32 %v1003_v25, %v560_v26  ;;  %v1056_v28 = vpop.f32.mrb[1].mxu1 }
 0x170   : > { %564 = vst.msk [vmem:[#allocation3] sm:$0xff] %vm408_vm1, %v561_v27 }
 0x173   : > { %v649_v30 = vpop.f32.mrb[2].mxu0 }
 0x174   : > { %v650_v31 = vadd.f32 %v1005_v29, %v649_v30  ;;  %v1067_v32 = vpop.f32.mrb[3].mxu0 }
 0x175   : > { %v654_v33 = vld [vmem:[#allocation2] sm:$0xff] }
 0x176   : > { %v653_v34 = vmul.f32 0.17677669, %v650_v31  ;;  %1069 = vmatpush3.xpose.msk.msra.mxu1 %vm408_vm1, %v654_v33 }
 0x177   : > { %1073 = vmatprep.subr.mxu1 %v1445_v1  ;;  %v655_v35 = vld [vmem:[#allocation3] sm:$0xff] }
 0x179   : > { %1071 = vmatmul.mubr.msk.f32.vlgmr.msra.gmra.mrb[2].mxu1 %vm408_vm1, %v653_v34 }
 0x17a   : > { %1074 = vmatpush3.msra.mxu1 %v655_v35  ;;  %1075 = vmatprep.mubr.msk.f32.mxu1 %vm1444_vm0, %v1445_v1 }
 0x24c   : > { %v728_v36 = vpop.f32.mrb[2].mxu1 }
 0x24d   : > { %807 = vst.msk [vmem:[%s391_s24] sm:$0xff] %vm732_vm2, %v728_v36  ;;  %v1072_v37 = vpop.f32.mrb[3].mxu1  ;;  %1076 = vmatmul.mubr.msk.f32.vlgmr.msra.gmra.mrb[4].mxu1 %vm732_vm2, %v728_v36 }
 0x24e   : > { %1326 = shalt.err (!%p1323_p0)
}
 0x24f   : > { %s1327_s23 = scalar_lea.hbm %s1757_s21, 128  ;;  %s1331_s27 = scalar_lea.hbm %s1870_s18, 256 }
 0x250   : > { %p1328_p4 = scmp.ne.s32.totalorder %s1757_s21, %s1327_s23  ;;  %p1332_p1 = scmp.lt.u32.totalorder %s1757_s21, %s1870_s18 }
 0x251   : > { %p1333_p12 = scmp.lt.u32.totalorder %s1331_s27, %s1327_s23  ;;  %p1335_p13 = scmp.lt.u32.totalorder %s1327_s23, %s1757_s21 }
 0x252   : > { %p1329_p2 = pnand %p1328_p4, %p1653_p10 }
 0x253   : > { %p1334_p11 = por %p1333_p12, %p1332_p1 }
 0x254   : > { %p1330_p8 = pneg %p1329_p2 }
 0x255   : > { %p1336_p6 = por %p1335_p13, %p1334_p11 }
 0x257   : > { %p1337_p3 = pnand %p1336_p6, %p1330_p8 }
 0x259   : > { %1340 = shalt.err (!%p1337_p3)
}
 0x25a   : > { %1111 = dma.vmem_to_hbm [thread:$0]  (%p1653_p10), %s843_s16, 128, %s1757_s21, %s814_s30  }
 0x25b   : > { %s384_s13 = scalar_lea.vmem [#allocation12], %s1711_s7  ;;  %s1871_s24 = sld [smem:[#allocation23_spill]] }
 0x25c   : > { %s828_s17 = sshll.u32 %s384_s13, 4  ;;  %s809_s23 = scalar_lea.sflag [#allocation6], %s1708_s22  ;;  %s1785_s17 = int_to_ptr.vmem [resolvable:$true] %s828_s17 }
 0x25d   : > { %s1341_s12 = scalar_lea.vmem %s1785_s17, 128  ;;  %s1447_s7 = smov [#allocation12]  }
 0x25e   : > { %p1342_p5 = scmp.ne.s32.totalorder %s1785_s17, %s1341_s12  ;;  %s1345_s19 = sshll.u32 %s1447_s7, 4  ;;  %s1346_s19 = int_to_ptr.vmem [resolvable:$false] %s1345_s19 }
 0x25f   : > { %p1348_p0 = scmp.lt.s32.totalorder %s1785_s17, %s1346_s19 }
 0x260   : > { %p1343_p7 = pnand %p1342_p5, %p1653_p10 }
 0x261   : > { %s1783_s27 = scalar_lea.hbm %s1871_s24, %s1012_s26  ;;  %s1347_s26 = scalar_lea.vmem %s1346_s19, 256 }
 0x262   : > { %p1344_p9 = pneg %p1343_p7  ;;  %p1349_p4 = scmp.lt.s32.totalorder %s1347_s26, %s1341_s12 }
 0x264   : > { %p1350_p2 = por %p1349_p4, %p1348_p0 }
 0x266   : > { %p1351_p8 = pnand %p1350_p2, %p1344_p9 }
 0x320   : > { %v802_v38 = vpop.f32.mrb[4].mxu1 }
 0x321   : > { %806 = vst.msk [vmem:[%s384_s13] sm:$0xff] %vm408_vm1, %v802_v38  ;;  %v1077_v39 = vpop.f32.mrb[5].mxu1 }
 0x322   : > { %1354 = shalt.err (!%p1351_p8)
}
 0x323   : > { %s1355_s22 = scalar_lea.hbm %s1783_s27, 128  ;;  %s1359_s30 = scalar_lea.hbm %s1871_s24, 256 }
 0x324   : > { %p1356_p1 = scmp.ne.s32.totalorder %s1783_s27, %s1355_s22  ;;  %p1360_p13 = scmp.lt.u32.totalorder %s1783_s27, %s1871_s24 }
 0x325   : > { %p1361_p6 = scmp.lt.u32.totalorder %s1359_s30, %s1355_s22  ;;  %p1363_p5 = scmp.lt.u32.totalorder %s1355_s22, %s1783_s27 }
 0x326   : > { %p1357_p12 = pnand %p1356_p1, %p1653_p10 }
 0x327   : > { %p1362_p3 = por %p1361_p6, %p1360_p13 }
 0x328   : > { %p1358_p11 = pneg %p1357_p12 }
 0x329   : > { %p1364_p7 = por %p1363_p5, %p1362_p3 }
 0x32b   : > { %p1365_p9 = pnand %p1364_p7, %p1358_p11 }
 0x32d   : > { %1368 = shalt.err (!%p1365_p9)
}
 0x32e   : > { %1110 = dma.vmem_to_hbm [thread:$0]  (%p1653_p10), %s1785_s17, 128, %s1783_s27, %s809_s23  }
 0x32f PF: > { %s1872_s14 = sld [smem:[#allocation20_spill]]  ;;  %s1873_s25 = sld [smem:[#allocation22_spill]] }
 0x330   : > { %p1875_p4 = scmp.ge.s32.totalorder %s1435_s10, 2 }
 0x335   : > { %s854_s12 = sand.u32 1, %s1872_s14   ;;  %p1874_p0 = scmp.ne.s32.totalorder %s1873_s25, 0 }
 0x336   : > { %s855_s7 = scalar_lea.sflag [#allocation6], %s854_s12 }
 0x337   : > { %p1129_p2 = pnand %p1875_p4, %p1874_p0 }
 0x339   : > { %1406 = dma.done.wait (!%p1129_p2), %s855_s7, 128  }
 0x33a   : > { %1408 = vsyncadd (!%p1129_p2), %s855_s7, 4294967168  ;;  %s864_s19 = scalar_lea.sflag [#allocation14], %s854_s12 }
 0x33b   : > { %1410 = dma.done.wait (!%p1129_p2), %s864_s19, 128  }
 0x33c   : > { %1412 = vsyncadd (!%p1129_p2), %s864_s19, 4294967168  ;;  %s30_s10 = sadd.s32 1, %s1435_s10   ;;  %s1876_s27 = smov %s1419_s28 }
 0x33d   : > { %p27_p8 = scmp.ge.s32.totalorder %s30_s10, 4   ;;  %s1877_s28 = smov %s1423_s29 }
 0x33e   : > { %s1878_s29 = smov %s1665_s11  ;;  %s1879_s30 = smov %s1431_s9 }
 0x33f   : > { %s1880_s9 = smov %s1882_s20  ;;  %29 = sbr.rel (!%p27_p8) target bundleno = 13 (0xd), region = 127 }
 0x346   :  { %869 = vsyncpa [#allocation5], 1 }
 0x347   :  { %871 = vsyncpa [#allocation5 + $0x1], 1 }
 0x348   :  { %872 = vsyncpa [#allocation8], 1 }
 0x349   :  { %873 = vsyncpa [#allocation11], 1 }
 0x34a   :  { %874 = vsyncpa [#allocation6], 1 }
 0x34b   :  { %876 = vsyncpa [#allocation6 + $0x1], 1 }
 0x34c   :  { %877 = vsyncpa [#allocation14], 1 }
 0x34d   :  { %879 = vsyncpa [#allocation14 + $0x1], 1 }

</bundles_post_ra>
